<compile_context>
chip_gen: v7x
topology: tpu7x:2x2x1
jax: 0.10.0
libtpu: 0.0.40
codegen_flags: <defaults>
</compile_context>

<pallas_src>
import jax
import jax.numpy as jnp
from jax.experimental import pallas as pl
from jax.experimental.pallas import tpu as pltpu


def _gemma3_mlp_kernel(x_ref, wg_ref, wu_ref, wd_ref, o_ref, acc_ref):
    k = pl.program_id(1)

    @pl.when(k == 0)
    def _():
        acc_ref[...] = jnp.zeros_like(acc_ref)

    x = x_ref[...]
    # Two MXU passes over this intermediate tile's gate / up slabs.
    g = jnp.dot(x, wg_ref[...], preferred_element_type=jnp.float32)
    u = jnp.dot(x, wu_ref[...], preferred_element_type=jnp.float32)
    # gelu_pytorch_tanh == tanh-approximate GELU
    h = jax.nn.gelu(g, approximate=True) * u
    # Partial down projection, accumulated over intermediate tiles (f32).
    acc_ref[...] += jnp.dot(h.astype(wd_ref.dtype), wd_ref[...],
                            preferred_element_type=jnp.float32)

    @pl.when(k == pl.num_programs(1) - 1)
    def _():
        o_ref[...] = acc_ref[...].astype(o_ref.dtype)


def _round_up(x, m):
    return (x + m - 1) // m * m


def _chip_generation():
    try:
        kind = jax.devices()[0].device_kind.lower()
    except Exception:  # pragma: no cover
        kind = ""
    if "v7" in kind:
        return "v7x"
    if "v6" in kind:
        return "v6e"
    if "v5" in kind and ("lite" in kind or "5e" in kind):
        return "v5e"
    return "unknown"


def _gen_tile_caps():
    """(tm_cap, ti_cap) per chip generation."""
    gen = _chip_generation()
    if gen == "v7x":
        # 64 MiB VMEM: spend it on tm, cap ti (ti does not reduce weight bytes).
        return 512, 512
    if gen == "v6e":
        # Roofline crossover ~650 FLOPs/byte: allow very large M tiles.
        return 1024, 1024
    if gen == "v5e":
        # Crossover ~240 FLOPs/byte: tm=256 already MXU-bound.
        return 256, 1024
    return 256, 1024


def _vmem_estimate(tm, ti, H, in_bytes, out_bytes):
    """Live VMEM model: double-buffered tiles + resident acc + per-step f32
    intermediates (g, u, h, h-as-compute-dtype) + Mosaic internal scratch."""
    dbuf = 2 * (tm * H * in_bytes          # x tile
                + 2 * H * ti * in_bytes    # gate + up weight slabs
                + ti * H * in_bytes        # down weight slab
                + tm * H * out_bytes)      # output tile
    acc = tm * H * 4
    interm = 3 * tm * ti * 4 + tm * ti * in_bytes
    mosaic_margin = 2 << 20
    return dbuf + acc + interm + mosaic_margin


def _choose_tiles(M, H, I, in_bytes, out_bytes, budget_bytes):
    """Largest MXU-friendly (tm, ti) fitting the VMEM budget, tm maximized
    first (tm sets arithmetic intensity; ti only amortizes grid overhead)."""
    tm_cap_gen, ti_cap_gen = _gen_tile_caps()
    m_cap = min(tm_cap_gen, _round_up(M, 16))          # bf16 min tile (16,128)
    tm_opts = sorted(
        {m_cap} | {t for t in (1024, 768, 512, 384, 256, 128, 64, 32, 16)
                   if t <= m_cap},
        reverse=True)
    i_cap = min(ti_cap_gen, _round_up(I, 128))
    ti_opts = sorted(
        {i_cap} | {t for t in (1024, 512, 256, 128) if t <= i_cap},
        reverse=True)

    for tm in tm_opts:
        for ti in ti_opts:
            if _vmem_estimate(tm, ti, H, in_bytes, out_bytes) <= budget_bytes:
                return tm, ti
    return tm_opts[-1], ti_opts[-1]


def gemma3_mlp(x, w_gate, w_up, w_down, *, compute_dtype=jnp.bfloat16,
               tm=None, ti=None):
    """x: [B, S, H]; w_gate/w_up: [H, I]; w_down: [I, H] (transposed nn.Linear).

    compute_dtype=bfloat16 (default): bf16 MXU operands, f32 accumulation.
    compute_dtype=None: exact path; requires consistent operand dtypes.
    """
    B, S, H = x.shape
    I = w_gate.shape[1]
    assert w_up.shape == (H, I) and w_down.shape == (I, H)

    out_dtype = x.dtype  # preserve caller dtype for the result
    if compute_dtype is not None:
        # No-op casts if the operands already arrive in compute_dtype
        # (production: store weights in bf16 so nothing is copied per call).
        x = x.astype(compute_dtype)
        w_gate = w_gate.astype(compute_dtype)
        w_up = w_up.astype(compute_dtype)
        w_down = w_down.astype(compute_dtype)
    else:
        assert x.dtype == w_gate.dtype == w_up.dtype == w_down.dtype, (
            "compute_dtype=None requires consistent operand dtypes; "
            "pass compute_dtype explicitly for mixed inputs")

    in_bytes = jnp.dtype(x.dtype).itemsize
    out_bytes = jnp.dtype(out_dtype).itemsize
    M = B * S

    # Per-generation VMEM sizing (v7x: 64 MiB; v5e/v6e: 128 MiB physical).
    try:
        info = pltpu.get_tpu_info()
        vmem_cap = int(getattr(info, "vmem_capacity_bytes", 64 << 20))
    except Exception:  # pragma: no cover - conservative fallback
        vmem_cap = 64 << 20
    budget = int(0.72 * vmem_cap)
    vmem_limit = int(min(0.92 * vmem_cap, 128 << 20))

    if tm is None or ti is None:
        tm_auto, ti_auto = _choose_tiles(M, H, I, in_bytes, out_bytes, budget)
        tm = tm if tm is not None else tm_auto
        ti = ti if ti is not None else ti_auto

    # Pad ragged M / I (exact: zero gate/up columns give gelu(0)*0 = 0; padded
    # rows are sliced off).  For aligned shapes nothing is materialized; in a
    # real model ragged-I padding would be done once at weight-load time.
    M_pad = _round_up(M, tm)
    I_pad = _round_up(I, ti)
    nk = I_pad // ti

    x2d = x.reshape(M, H)
    if M_pad != M:
        x2d = jnp.pad(x2d, ((0, M_pad - M), (0, 0)))
    if I_pad != I:
        w_gate = jnp.pad(w_gate, ((0, 0), (0, I_pad - I)))
        w_up = jnp.pad(w_up, ((0, 0), (0, I_pad - I)))
        w_down = jnp.pad(w_down, ((0, I_pad - I), (0, 0)))

    cost = pl.CostEstimate(
        flops=6 * M * H * I,                       # 3 matmuls, 2 flops/MAC
        transcendentals=M * I,                     # tanh in GELU
        bytes_accessed=(2 * M * H + 3 * H * I) * in_bytes,
    )

    out2d = pl.pallas_call(
        _gemma3_mlp_kernel,
        out_shape=jax.ShapeDtypeStruct((M_pad, H), out_dtype),
        grid_spec=pltpu.PrefetchScalarGridSpec(
            num_scalar_prefetch=0,
            grid=(M_pad // tm, nk),
            in_specs=[
                pl.BlockSpec((tm, H), lambda i, k: (i, 0)),    # x tile
                pl.BlockSpec((H, ti), lambda i, k: (0, k)),    # gate slab
                pl.BlockSpec((H, ti), lambda i, k: (0, k)),    # up slab
                pl.BlockSpec((ti, H), lambda i, k: (k, 0)),    # down slab
            ],
            out_specs=pl.BlockSpec((tm, H), lambda i, k: (i, 0)),
            scratch_shapes=[pltpu.VMEM((tm, H), jnp.float32)],
        ),
        compiler_params=pltpu.CompilerParams(
            dimension_semantics=("parallel", "arbitrary"),
            vmem_limit_bytes=vmem_limit,
        ),
        cost_estimate=cost,
    )(x2d, w_gate, w_up, w_down)

    if M_pad != M:
        out2d = out2d[:M]
    return out2d.reshape(B, S, H)


def _reference(x, w_gate, w_up, w_down):
    g = jnp.einsum("bsh,hi->bsi", x, w_gate)
    u = jnp.einsum("bsh,hi->bsi", x, w_up)
    h = jax.nn.gelu(g, approximate=True) * u
    return jnp.einsum("bsi,ih->bsh", h, w_down)


if __name__ == "__main__":
    # Small shapes consistent with the module's forward.
    batch, seq = 2, 8
    hidden_size = 128
    intermediate_size = 256

    key = jax.random.PRNGKey(0)
    kx, kg, ku, kd = jax.random.split(key, 4)

    x = jax.random.normal(kx, (batch, seq, hidden_size), dtype=jnp.float32)
    scale_h = 1.0 / jnp.sqrt(hidden_size)
    scale_i = 1.0 / jnp.sqrt(intermediate_size)
    w_gate = jax.random.normal(kg, (hidden_size, intermediate_size), jnp.float32) * scale_h
    w_up   = jax.random.normal(ku, (hidden_size, intermediate_size), jnp.float32) * scale_h
    w_down = jax.random.normal(kd, (intermediate_size, hidden_size), jnp.float32) * scale_i

    # 1) Exact f32 path vs. pure-JAX reference.
    out = jax.block_until_ready(gemma3_mlp(x, w_gate, w_up, w_down, compute_dtype=None))
    ref = _reference(x, w_gate, w_up, w_down)
    assert out.shape == (batch, seq, hidden_size)
    assert jnp.allclose(out, ref, atol=1e-4, rtol=1e-4), "f32 mismatch vs reference"

    # 2) Default bf16-operand / f32-accumulate path (production recipe).
    out_bf16 = jax.block_until_ready(gemma3_mlp(x, w_gate, w_up, w_down))
    ref_bf16 = _reference(x.astype(jnp.bfloat16).astype(jnp.float32),
                          w_gate.astype(jnp.bfloat16).astype(jnp.float32),
                          w_up.astype(jnp.bfloat16).astype(jnp.float32),
                          w_down.astype(jnp.bfloat16).astype(jnp.float32))
    assert out_bf16.shape == (batch, seq, hidden_size)
    assert out_bf16.dtype == x.dtype
    assert jnp.all(jnp.isfinite(out_bf16.astype(jnp.float32)))
    assert jnp.allclose(out_bf16.astype(jnp.float32), ref_bf16, atol=1e-1, rtol=1e-1), \
        "bf16 mismatch vs reference"

    # 3) Ragged shapes (exercise M / I padding paths) on the exact path.
    xr = jax.random.normal(kx, (1, 5, hidden_size), dtype=jnp.float32)
    wgr = w_gate[:, :200]
    wur = w_up[:, :200]
    wdr = w_down[:200, :]
    out_r = jax.block_until_ready(gemma3_mlp(xr, wgr, wur, wdr, compute_dtype=None))
    ref_r = _reference(xr, wgr, wur, wdr)
    assert out_r.shape == (1, 5, hidden_size)
    assert jnp.allclose(out_r, ref_r, atol=1e-4, rtol=1e-4), "ragged mismatch vs reference"

    print("KERNEL_OK")
</pallas_src>

<mosaic_0001>
module attributes {stable_mosaic.version = 11 : i64} {
  func.func @_gemma3_mlp_kernel(%arg0: i32, %arg1: i32, %arg2: memref<16x128xf32, #tpu.memory_space<vmem>>, %arg3: memref<128x256xf32, #tpu.memory_space<vmem>>, %arg4: memref<128x256xf32, #tpu.memory_space<vmem>>, %arg5: memref<256x128xf32, #tpu.memory_space<vmem>>, %arg6: memref<16x128xf32, #tpu.memory_space<vmem>>, %arg7: memref<16x128xf32, #tpu.memory_space<vmem>>) attributes {dimension_semantics = [#tpu.dimension_semantics<parallel>, #tpu.dimension_semantics<arbitrary>], iteration_bounds = array<i64: 1, 1>, scalar_prefetch = 0 : i64, scratch_operands = 1 : i64, tpu.core_type = #tpu.core_type<tc>, window_params = [{transform_indices = @transform_0, window_bounds = array<i64: 16, 128>}, {transform_indices = @transform_1, window_bounds = array<i64: 128, 256>}, {transform_indices = @transform_2, window_bounds = array<i64: 128, 256>}, {transform_indices = @transform_3, window_bounds = array<i64: 256, 128>}, {transform_indices = @transform_4, window_bounds = array<i64: 16, 128>}]} {
    %c0_i32 = arith.constant 0 : i32
    %0 = arith.cmpi eq, %arg1, %c0_i32 : i32
    %1 = arith.extui %0 : i1 to i32
    %c0_i32_0 = arith.constant 0 : i32
    %2 = arith.cmpi ne, %1, %c0_i32_0 : i32
    scf.if %2 {
      %cst_20 = arith.constant 0.000000e+00 : f32
      %30 = vector.broadcast %cst_20 : f32 to vector<16x128xf32>
      %c0_21 = arith.constant 0 : index
      %c0_22 = arith.constant 0 : index
      %31 = vector.load %arg7[%c0_21, %c0_22] : memref<16x128xf32, #tpu.memory_space<vmem>>, vector<16x128xf32>
      tpu.vector_store %arg7[%c0_21, %c0_22], %30 {strides = array<i32>} : memref<16x128xf32, #tpu.memory_space<vmem>>, vector<16x128xf32>,
    } else {
    }
    %c0 = arith.constant 0 : index
    %c0_1 = arith.constant 0 : index
    %3 = vector.load %arg2[%c0, %c0_1] : memref<16x128xf32, #tpu.memory_space<vmem>>, vector<16x128xf32>
    %c0_2 = arith.constant 0 : index
    %c0_3 = arith.constant 0 : index
    %4 = vector.load %arg3[%c0_2, %c0_3] : memref<128x256xf32, #tpu.memory_space<vmem>>, vector<128x256xf32>
    %cst = arith.constant dense<0.000000e+00> : vector<16x256xf32>
    %5 = tpu.matmul %3, %4, %cst {dimension_numbers = #tpu.dot_dimension_numbers<[1], [0], [0], [1], [0, 0, 1, 1], [], []>} : vector<16x128xf32>, vector<128x256xf32>, vector<16x256xf32> -> vector<16x256xf32>
    %c0_4 = arith.constant 0 : index
    %c0_5 = arith.constant 0 : index
    %6 = vector.load %arg4[%c0_4, %c0_5] : memref<128x256xf32, #tpu.memory_space<vmem>>, vector<128x256xf32>
    %cst_6 = arith.constant dense<0.000000e+00> : vector<16x256xf32>
    %7 = tpu.matmul %3, %6, %cst_6 {dimension_numbers = #tpu.dot_dimension_numbers<[1], [0], [0], [1], [0, 0, 1, 1], [], []>} : vector<16x128xf32>, vector<128x256xf32>, vector<16x256xf32> -> vector<16x256xf32>
    %8 = arith.mulf %5, %5 : vector<16x256xf32>
    %9 = arith.mulf %5, %8 : vector<16x256xf32>
    %cst_7 = arith.constant 4.471500e-02 : f32
    %10 = vector.broadcast %cst_7 : f32 to vector<16x256xf32>
    %11 = arith.mulf %10, %9 : vector<16x256xf32>
    %12 = arith.addf %5, %11 : vector<16x256xf32>
    %cst_8 = arith.constant 0.797884583 : f32
    %13 = vector.broadcast %cst_8 : f32 to vector<16x256xf32>
    %14 = arith.mulf %13, %12 : vector<16x256xf32>
    %15 = math.tanh %14 : vector<16x256xf32>
    %cst_9 = arith.constant 1.000000e+00 : f32
    %16 = vector.broadcast %cst_9 : f32 to vector<16x256xf32>
    %17 = arith.addf %16, %15 : vector<16x256xf32>
    %cst_10 = arith.constant 5.000000e-01 : f32
    %18 = vector.broadcast %cst_10 : f32 to vector<16x256xf32>
    %19 = arith.mulf %18, %17 : vector<16x256xf32>
    %20 = arith.mulf %5, %19 : vector<16x256xf32>
    %21 = arith.mulf %20, %7 : vector<16x256xf32>
    %c0_11 = arith.constant 0 : index
    %c0_12 = arith.constant 0 : index
    %22 = vector.load %arg7[%c0_11, %c0_12] : memref<16x128xf32, #tpu.memory_space<vmem>>, vector<16x128xf32>
    %c0_13 = arith.constant 0 : index
    %c0_14 = arith.constant 0 : index
    %23 = vector.load %arg5[%c0_13, %c0_14] : memref<256x128xf32, #tpu.memory_space<vmem>>, vector<256x128xf32>
    %cst_15 = arith.constant dense<0.000000e+00> : vector<16x128xf32>
    %24 = tpu.matmul %21, %23, %cst_15 {dimension_numbers = #tpu.dot_dimension_numbers<[1], [0], [0], [1], [0, 0, 1, 1], [], []>} : vector<16x256xf32>, vector<256x128xf32>, vector<16x128xf32> -> vector<16x128xf32>
    %25 = arith.addf %22, %24 : vector<16x128xf32>
    %c0_16 = arith.constant 0 : index
    %c0_17 = arith.constant 0 : index
    %26 = vector.load %arg7[%c0_16, %c0_17] : memref<16x128xf32, #tpu.memory_space<vmem>>, vector<16x128xf32>
    tpu.vector_store %arg7[%c0_16, %c0_17], %25 {strides = array<i32>} : memref<16x128xf32, #tpu.memory_space<vmem>>, vector<16x128xf32>,
    %c0_i32_18 = arith.constant 0 : i32
    %27 = arith.cmpi eq, %arg1, %c0_i32_18 : i32
    %28 = arith.extui %27 : i1 to i32
    %c0_i32_19 = arith.constant 0 : i32
    %29 = arith.cmpi ne, %28, %c0_i32_19 : i32
    scf.if %29 {
      %c0_20 = arith.constant 0 : index
      %c0_21 = arith.constant 0 : index
      %30 = vector.load %arg7[%c0_20, %c0_21] : memref<16x128xf32, #tpu.memory_space<vmem>>, vector<16x128xf32>
      %c0_22 = arith.constant 0 : index
      %c0_23 = arith.constant 0 : index
      %31 = vector.load %arg6[%c0_22, %c0_23] : memref<16x128xf32, #tpu.memory_space<vmem>>, vector<16x128xf32>
      tpu.vector_store %arg6[%c0_22, %c0_23], %30 {strides = array<i32>} : memref<16x128xf32, #tpu.memory_space<vmem>>, vector<16x128xf32>,
    } else {
    }
    return
  }
  func.func @transform_0(%arg0: i32, %arg1: i32) -> (i32, i32) {
    %c0_i32 = arith.constant 0 : i32
    %c0_i32_0 = arith.constant 0 : i32
    return %arg0, %c0_i32 : i32, i32
  }
  func.func @transform_1(%arg0: i32, %arg1: i32) -> (i32, i32) {
    %c0_i32 = arith.constant 0 : i32
    %c0_i32_0 = arith.constant 0 : i32
    return %c0_i32, %arg1 : i32, i32
  }
  func.func @transform_2(%arg0: i32, %arg1: i32) -> (i32, i32) {
    %c0_i32 = arith.constant 0 : i32
    %c0_i32_0 = arith.constant 0 : i32
    return %c0_i32, %arg1 : i32, i32
  }
  func.func @transform_3(%arg0: i32, %arg1: i32) -> (i32, i32) {
    %c0_i32 = arith.constant 0 : i32
    %c0_i32_0 = arith.constant 0 : i32
    return %arg1, %c0_i32 : i32, i32
  }
  func.func @transform_4(%arg0: i32, %arg1: i32) -> (i32, i32) {
    %c0_i32 = arith.constant 0 : i32
    %c0_i32_0 = arith.constant 0 : i32
    return %arg0, %c0_i32 : i32, i32
  }
}

</mosaic_0001>

<bundles_post_ra>
// kernel: tpu_custom_call.1
= control target key start
LH: loop header
LB: loop body
LE: loop exit
PB: predicated region body
PF: predicated region fallthrough
CT: control target
= control target key end

     0   :  { %9 = vsyncpa [#allocation4], 0  ;;  %s885_s0 = inlined_call_operand.hbm [shape: f32[16,128], index: 0, kind: input, shape index: {}]   ;;  %s886_s1 = inlined_call_operand.hbm [shape: f32[128,256], index: 1, kind: input, shape index: {}]   ;;  %s887_s2 = inlined_call_operand.hbm [shape: f32[128,256], index: 2, kind: input, shape index: {}]   ;;  %s888_s3 = inlined_call_operand.hbm [shape: f32[256,128], index: 3, kind: input, shape index: {}]   ;;  %s889_s4 = inlined_call_operand.hbm [shape: f32[16,128], index: 4, kind: output, shape index: {}]  }
   0x1   :  { %10 = vsyncpa [#allocation7], 0 }
   0x2   :  { %11 = vsyncpa [#allocation10], 0 }
   0x3   :  { %12 = vsyncpa [#allocation5], 0  ;;  %s764_s15 = smov [#allocation6]   ;;  %s646_s19 = scalar_lea.hbm %s886_s1, 4096 }
   0x4   :  { %s30_s16 = sshll.u32 %s764_s15, 4  ;;  %p647_p0 = scmp.ne.s32.totalorder %s886_s1, %s646_s19  ;;  %s31_s16 = int_to_ptr.vmem [resolvable:$true] %s30_s16 }
   0x5   :  { %p650_p1 = scmp.lt.u32.totalorder %s646_s19, %s886_s1 }
   0x7   :  { %p652_p2 = pnand %p650_p1, %p647_p0 }
   0x9   :  { %655 = shalt.err (!%p652_p2)
}
   0xa   :  { %s656_s24 = scalar_lea.vmem %s31_s16, 4096  ;;  %p661_p4 = scmp.lt.s32.totalorder %s31_s16, %s31_s16 }
   0xb   :  { %p657_p3 = scmp.ne.s32.totalorder %s31_s16, %s656_s24  ;;  %p662_p5 = scmp.lt.s32.totalorder %s656_s24, %s656_s24 }
   0xd   :  { %p663_p6 = por %p662_p5, %p661_p4 }
   0xf   :  { %p664_p7 = pnand %p663_p6, %p657_p3 }
  0x11   :  { %667 = shalt.err (!%p664_p7)
}
  0x12   :  { %s765_s25 = smov 256   ;;  %s766_s26 = smov 16  }
  0x13   :  { %36 = dma.hbm_to_vmem [thread:$0]  %s886_s1, 4096, %s31_s16, [#allocation7], %s765_s25, %s765_s25, %s766_s26  }
  0x14   :  { %s767_s29 = smov [#allocation3]   ;;  %s668_s7 = scalar_lea.hbm %s885_s0, 256 }
  0x15   :  { %s18_s30 = sshll.u32 %s767_s29, 4  ;;  %p669_p8 = scmp.ne.s32.totalorder %s885_s0, %s668_s7  ;;  %s19_s30 = int_to_ptr.vmem [resolvable:$true] %s18_s30 }
  0x16   :  { %p672_p9 = scmp.lt.u32.totalorder %s668_s7, %s885_s0 }
  0x18   :  { %p674_p10 = pnand %p672_p9, %p669_p8 }
  0x1a   :  { %677 = shalt.err (!%p674_p10)
}
  0x1b   :  { %s678_s12 = scalar_lea.vmem %s19_s30, 256  ;;  %p683_p12 = scmp.lt.s32.totalorder %s19_s30, %s19_s30 }
  0x1c   :  { %p679_p11 = scmp.ne.s32.totalorder %s19_s30, %s678_s12  ;;  %p684_p13 = scmp.lt.s32.totalorder %s678_s12, %s678_s12 }
  0x1e   :  { %p685_p0 = por %p684_p13, %p683_p12 }
  0x20   :  { %p686_p1 = pnand %p685_p0, %p679_p11 }
  0x22   :  { %689 = shalt.err (!%p686_p1)
}
  0x23   :  { %s768_s1 = smov 128   ;;  %s769_s13 = smov 8  }
  0x24   :  { %24 = dma.hbm_to_vmem [thread:$0]  %s885_s0, 256, %s19_s30, [#allocation4], %s768_s1, %s768_s1, %s769_s13  }
  0x25   :  { %s770_s16 = smov [#allocation8]   ;;  %s771_s18 = smov [#allocation9]  }
  0x26   :  { %s42_s17 = sshll.u32 %s770_s16, 4  ;;  %s54_s19 = sshll.u32 %s771_s18, 4  ;;  %s43_s17 = int_to_ptr.vmem [resolvable:$true] %s42_s17  ;;  %s829_s19 = int_to_ptr.vmem [resolvable:$true] %s54_s19 }
  0x27   :  { %s690_s22 = scalar_lea.hbm %s887_s2, 4096 }
  0x28   :  { %p691_p2 = scmp.ne.s32.totalorder %s887_s2, %s690_s22  ;;  %p694_p3 = scmp.lt.u32.totalorder %s690_s22, %s887_s2 }
  0x2a   :  { %p696_p4 = pnand %p694_p3, %p691_p2 }
  0x2c   :  { %699 = shalt.err (!%p696_p4)
}
  0x2d   :  { %s700_s0 = scalar_lea.vmem %s43_s17, 4096  ;;  %p705_p6 = scmp.lt.s32.totalorder %s43_s17, %s43_s17 }
  0x2e   :  { %p701_p5 = scmp.ne.s32.totalorder %s43_s17, %s700_s0  ;;  %p706_p7 = scmp.lt.s32.totalorder %s700_s0, %s700_s0 }
  0x30   :  { %p707_p8 = por %p706_p7, %p705_p6 }
  0x32   :  { %p708_p9 = pnand %p707_p8, %p701_p5 }
  0x34   :  { %711 = shalt.err (!%p708_p9)
}
  0x35   :  { %48 = dma.hbm_to_vmem [thread:$0]  %s887_s2, 4096, %s43_s17, [#allocation7], %s765_s25, %s765_s25, %s766_s26  }
  0x36   :  { %s712_s7 = scalar_lea.hbm %s888_s3, 4096 }
  0x37   :  { %p713_p10 = scmp.ne.s32.totalorder %s888_s3, %s712_s7  ;;  %p716_p11 = scmp.lt.u32.totalorder %s712_s7, %s888_s3 }
  0x39   :  { %p718_p12 = pnand %p716_p11, %p713_p10 }
  0x3b   :  { %721 = shalt.err (!%p718_p12)
}
  0x3c   :  { %s722_s12 = scalar_lea.vmem %s829_s19, 4096  ;;  %p727_p0 = scmp.lt.s32.totalorder %s829_s19, %s829_s19 }
  0x3d   :  { %p723_p13 = scmp.ne.s32.totalorder %s829_s19, %s722_s12  ;;  %p728_p1 = scmp.lt.s32.totalorder %s722_s12, %s722_s12 }
  0x3f   :  { %p729_p2 = por %p728_p1, %p727_p0 }
  0x41   :  { %p730_p3 = pnand %p729_p2, %p723_p13 }
  0x43   :  { %733 = shalt.err (!%p730_p3)
}
  0x44   :  { %60 = dma.hbm_to_vmem [thread:$0]  %s888_s3, 4096, %s829_s19, [#allocation10], %s768_s1, %s768_s1, %s769_s13  }
  0x45   :  { %756 = dma.done.wait [#allocation4], 256  }
  0x46   :  { %757 = vsyncadd [#allocation4], 4294967040 }
  0x47   :  { %758 = dma.done.wait [#allocation7], 8192  }
  0x48   :  { %759 = vsyncadd [#allocation7], 4294959104 }
  0x49   :  { %760 = dma.done.wait [#allocation10], 4096  }
  0x4a   :  { %761 = vsyncadd [#allocation10], 4294963200  ;;  %v772_v0 = vmov 0.0   ;;  %v82_v1 = vld [vmem:[#allocation6 + $0x8] sm:$0xff]  ;;  %v84_v2 = vld [vmem:[#allocation6 + $0x18] sm:$0xff]  ;;  %s773_s3 = smov [#allocation11]  }
  0x4b   :  { %177 = vmatprep.mubr.f32.mxu0 %v772_v0  ;;  %286 = vmatprep.mubr.f32.mxu1 %v772_v0  ;;  %v81_v3 = vld [vmem:[#allocation6] sm:$0xff]  ;;  %v516_v4 = vpack.c.bf16 %v84_v2, %v82_v1  ;;  %v83_v5 = vld [vmem:[#allocation6 + $0x10] sm:$0xff]  ;;  %v86_v6 = vld [vmem:[#allocation6 + $0x28] sm:$0xff]  ;;  %s464_s26 = sshll.u32 %s773_s3, 4  ;;  %s465_s26 = int_to_ptr.vmem [resolvable:$true] %s464_s26 }
  0x4c   :  { %v88_v7 = vld [vmem:[#allocation6 + $0x38] sm:$0xff]  ;;  %v518_v8 = vpack.c.bf16 %v83_v5, %v81_v3  ;;  %v85_v10 = vld [vmem:[#allocation6 + $0x20] sm:$0xff]  ;;  %v87_v11 = vld [vmem:[#allocation6 + $0x30] sm:$0xff]  ;;  %s734_s14 = scalar_lea.vmem %s465_s26, 256  ;;  %p739_p5 = scmp.lt.s32.totalorder %s465_s26, %s465_s26 }
  0x4d   :  { %v520_v9 = vpack.c.bf16 %v88_v7, %v86_v6  ;;  %v90_v12 = vld [vmem:[#allocation6 + $0x48] sm:$0xff]  ;;  %517 = vmatprep.subr.bf16.mxu0 %v516_v4  ;;  %v92_v13 = vld [vmem:[#allocation6 + $0x58] sm:$0xff]  ;;  %v522_v14 = vpack.c.bf16 %v87_v11, %v85_v10  ;;  %v89_v16 = vld [vmem:[#allocation6 + $0x40] sm:$0xff]  ;;  %p735_p4 = scmp.ne.s32.totalorder %s465_s26, %s734_s14  ;;  %p740_p6 = scmp.lt.s32.totalorder %s734_s14, %s734_s14 }
  0x4e   :  { %519 = vmatpush1.bf16.msra.mxu0 %v518_v8  ;;  %v524_v15 = vpack.c.bf16 %v92_v13, %v90_v12  ;;  %v91_v17 = vld [vmem:[#allocation6 + $0x50] sm:$0xff]  ;;  %v94_v18 = vld [vmem:[#allocation6 + $0x68] sm:$0xff]  ;;  %v96_v19 = vld [vmem:[#allocation6 + $0x78] sm:$0xff] }
  0x4f   :  { %521 = vmatprep.subr.bf16.mxu0 %v520_v9  ;;  %v526_v20 = vpack.c.bf16 %v91_v17, %v89_v16  ;;  %v93_v21 = vld [vmem:[#allocation6 + $0x60] sm:$0xff]  ;;  %v95_v22 = vld [vmem:[#allocation6 + $0x70] sm:$0xff]  ;;  %v528_v23 = vpack.c.bf16 %v96_v19, %v94_v18  ;;  %v98_v24 = vld [vmem:[#allocation6 + $0x88] sm:$0xff]  ;;  %p741_p7 = por %p740_p6, %p739_p5 }
  0x50   :  { %v191_v25 = vld [vmem:[#allocation8 + $0x8] sm:$0xff]  ;;  %v193_v26 = vld [vmem:[#allocation8 + $0x18] sm:$0xff]  ;;  %v190_v29 = vld [vmem:[#allocation8] sm:$0xff]  ;;  %v530_v34 = vpack.c.bf16 %v95_v22, %v93_v21 }
  0x51   :  { %v100_v27 = vld [vmem:[#allocation6 + $0x98] sm:$0xff]  ;;  %v548_v28 = vpack.c.bf16 %v193_v26, %v191_v25  ;;  %v192_v30 = vld [vmem:[#allocation8 + $0x10] sm:$0xff]  ;;  %v97_v31 = vld [vmem:[#allocation6 + $0x80] sm:$0xff]  ;;  %p742_p8 = pnand %p741_p7, %p735_p4 }
  0x52   :  { %523 = vmatpush1.bf16.msra.mxu0 %v522_v14  ;;  %v99_v32 = vld [vmem:[#allocation6 + $0x90] sm:$0xff]  ;;  %v550_v33 = vpack.c.bf16 %v192_v30, %v190_v29  ;;  %v102_v35 = vld [vmem:[#allocation6 + $0xa8] sm:$0xff]  ;;  %v197_v37 = vld [vmem:[#allocation8 + $0x38] sm:$0xff]  ;;  %v532_v39 = vpack.c.bf16 %v100_v27, %v98_v24 }
  0x53   :  { %525 = vmatprep.subr.bf16.mxu0 %v524_v15  ;;  %549 = vmatprep.subr.bf16.mxu1 %v548_v28  ;;  %v195_v36 = vld [vmem:[#allocation8 + $0x28] sm:$0xff]  ;;  %v194_v38 = vld [vmem:[#allocation8 + $0x20] sm:$0xff]  ;;  %v104_v40 = vld [vmem:[#allocation6 + $0xb8] sm:$0xff]  ;;  %v534_v51 = vpack.c.bf16 %v99_v32, %v97_v31 }
  0x54   :  { %551 = vmatpush1.bf16.msra.mxu1 %v550_v33  ;;  %v552_v41 = vpack.c.bf16 %v197_v37, %v195_v36  ;;  %v196_v42 = vld [vmem:[#allocation8 + $0x30] sm:$0xff]  ;;  %v199_v43 = vld [vmem:[#allocation8 + $0x48] sm:$0xff]  ;;  %v201_v45 = vld [vmem:[#allocation8 + $0x58] sm:$0xff]  ;;  %v536_v52 = vpack.c.bf16 %v104_v40, %v102_v35 }
  0x55   :  { %v554_v44 = vpack.c.bf16 %v196_v42, %v194_v38  ;;  %v198_v46 = vld [vmem:[#allocation8 + $0x40] sm:$0xff]  ;;  %v200_v47 = vld [vmem:[#allocation8 + $0x50] sm:$0xff]  ;;  %v556_v48 = vpack.c.bf16 %v201_v45, %v199_v43  ;;  %v203_v49 = vld [vmem:[#allocation8 + $0x68] sm:$0xff] }
  0x56   :  { %527 = vmatpush1.bf16.msra.mxu0 %v526_v20  ;;  %553 = vmatprep.subr.bf16.mxu1 %v552_v41  ;;  %v205_v50 = vld [vmem:[#allocation8 + $0x78] sm:$0xff]  ;;  %v101_v53 = vld [vmem:[#allocation6 + $0xa0] sm:$0xff]  ;;  %v103_v54 = vld [vmem:[#allocation6 + $0xb0] sm:$0xff]  ;;  %v558_v56 = vpack.c.bf16 %v200_v47, %v198_v46 }
  0x57   :  { %529 = vmatprep.subr.bf16.mxu0 %v528_v23  ;;  %v106_v55 = vld [vmem:[#allocation6 + $0xc8] sm:$0xff]  ;;  %v108_v57 = vld [vmem:[#allocation6 + $0xd8] sm:$0xff]  ;;  %v560_v58 = vpack.c.bf16 %v205_v50, %v203_v49  ;;  %v202_v59 = vld [vmem:[#allocation8 + $0x60] sm:$0xff]  ;;  %v538_v63 = vpack.c.bf16 %v103_v54, %v101_v53 }
  0x58   :  { %555 = vmatpush1.bf16.msra.mxu1 %v554_v44  ;;  %v204_v60 = vld [vmem:[#allocation8 + $0x70] sm:$0xff]  ;;  %v207_v61 = vld [vmem:[#allocation8 + $0x88] sm:$0xff]  ;;  %v209_v62 = vld [vmem:[#allocation8 + $0x98] sm:$0xff]  ;;  %v540_v1 = vpack.c.bf16 %v108_v57, %v106_v55 }
  0x59   :  { %557 = vmatprep.subr.bf16.mxu1 %v556_v48  ;;  %v105_v2 = vld [vmem:[#allocation6 + $0xc0] sm:$0xff]  ;;  %v107_v3 = vld [vmem:[#allocation6 + $0xd0] sm:$0xff]  ;;  %v110_v4 = vld [vmem:[#allocation6 + $0xe8] sm:$0xff]  ;;  %v562_v5 = vpack.c.bf16 %v204_v60, %v202_v59  ;;  %v564_v7 = vpack.c.bf16 %v209_v62, %v207_v61 }
  0x5a   :  { %531 = vmatpush1.bf16.msra.mxu0 %v530_v34  ;;  %v112_v6 = vld [vmem:[#allocation6 + $0xf8] sm:$0xff]  ;;  %v206_v8 = vld [vmem:[#allocation8 + $0x80] sm:$0xff]  ;;  %v208_v9 = vld [vmem:[#allocation8 + $0x90] sm:$0xff]  ;;  %v542_v12 = vpack.c.bf16 %v107_v3, %v105_v2 }
  0x5b   :  { %533 = vmatprep.subr.bf16.mxu0 %v532_v39  ;;  %v211_v10 = vld [vmem:[#allocation8 + $0xa8] sm:$0xff]  ;;  %v213_v11 = vld [vmem:[#allocation8 + $0xb8] sm:$0xff]  ;;  %v544_v13 = vpack.c.bf16 %v112_v6, %v110_v4  ;;  %v109_v14 = vld [vmem:[#allocation6 + $0xe0] sm:$0xff]  ;;  %v566_v16 = vpack.c.bf16 %v208_v9, %v206_v8 }
  0x5c   :  { %559 = vmatpush1.bf16.msra.mxu1 %v558_v56  ;;  %v111_v15 = vld [vmem:[#allocation6 + $0xf0] sm:$0xff]  ;;  %v568_v17 = vpack.c.bf16 %v213_v11, %v211_v10  ;;  %v210_v18 = vld [vmem:[#allocation8 + $0xa0] sm:$0xff]  ;;  %v215_v20 = vld [vmem:[#allocation8 + $0xc8] sm:$0xff] }
  0x5d   :  { %561 = vmatprep.subr.bf16.mxu1 %v560_v58  ;;  %v212_v19 = vld [vmem:[#allocation8 + $0xb0] sm:$0xff]  ;;  %v217_v21 = vld [vmem:[#allocation8 + $0xd8] sm:$0xff]  ;;  %v546_v22 = vpack.c.bf16 %v111_v15, %v109_v14  ;;  %v214_v25 = vld [vmem:[#allocation8 + $0xc0] sm:$0xff] }
  0x5e   :  { %535 = vmatpush1.bf16.msra.mxu0 %v534_v51  ;;  %v570_v23 = vpack.c.bf16 %v212_v19, %v210_v18  ;;  %v572_v24 = vpack.c.bf16 %v217_v21, %v215_v20  ;;  %v216_v26 = vld [vmem:[#allocation8 + $0xd0] sm:$0xff]  ;;  %v219_v27 = vld [vmem:[#allocation8 + $0xe8] sm:$0xff]  ;;  %v221_v28 = vld [vmem:[#allocation8 + $0xf8] sm:$0xff] }
  0x5f   :  { %537 = vmatprep.subr.bf16.mxu0 %v536_v52  ;;  %v79_v29 = vld [vmem:[#allocation3] sm:$0xff]  ;;  %v574_v30 = vpack.c.bf16 %v216_v26, %v214_v25  ;;  %v576_v31 = vpack.c.bf16 %v221_v28, %v219_v27  ;;  %v218_v32 = vld [vmem:[#allocation8 + $0xe0] sm:$0xff]  ;;  %v80_v34 = vld [vmem:[#allocation3 + $0x8] sm:$0xff] }
  0x60   :  { %563 = vmatpush1.bf16.msra.mxu1 %v562_v5  ;;  %v220_v33 = vld [vmem:[#allocation8 + $0xf0] sm:$0xff]  ;;  %v357_v36 = vld [vmem:[#allocation9 + $0x80] sm:$0xff]  ;;  %v358_v37 = vld [vmem:[#allocation9 + $0x88] sm:$0xff] }
  0x61   :  { %565 = vmatprep.subr.bf16.mxu1 %v564_v7  ;;  %v578_v35 = vpack.c.bf16 %v220_v33, %v218_v32  ;;  %v580_v38 = vpack.c.bf16 %v358_v37, %v357_v36  ;;  %v341_v39 = vld [vmem:[#allocation9] sm:$0xff]  ;;  %v342_v40 = vld [vmem:[#allocation9 + $0x8] sm:$0xff]  ;;  %v359_v42 = vld [vmem:[#allocation9 + $0x90] sm:$0xff] }
  0x62   :  { %539 = vmatpush1.bf16.msra.mxu0 %v538_v63  ;;  %v582_v41 = vpack.c.bf16 %v342_v40, %v341_v39  ;;  %v360_v43 = vld [vmem:[#allocation9 + $0x98] sm:$0xff]  ;;  %v343_v45 = vld [vmem:[#allocation9 + $0x10] sm:$0xff]  ;;  %v362_v48 = vld [vmem:[#allocation9 + $0xa8] sm:$0xff] }
  0x63   :  { %541 = vmatprep.subr.bf16.mxu0 %v540_v1  ;;  %v584_v44 = vpack.c.bf16 %v360_v43, %v359_v42  ;;  %v344_v46 = vld [vmem:[#allocation9 + $0x18] sm:$0xff]  ;;  %v345_v50 = vld [vmem:[#allocation9 + $0x20] sm:$0xff]  ;;  %v346_v51 = vld [vmem:[#allocation9 + $0x28] sm:$0xff] }
  0x64   :  { %567 = vmatpush1.bf16.msra.mxu1 %v566_v16  ;;  %v586_v47 = vpack.c.bf16 %v344_v46, %v343_v45  ;;  %v590_v52 = vpack.c.bf16 %v346_v51, %v345_v50  ;;  %v363_v53 = vld [vmem:[#allocation9 + $0xb0] sm:$0xff]  ;;  %v364_v54 = vld [vmem:[#allocation9 + $0xb8] sm:$0xff]  ;;  %v365_v59 = vld [vmem:[#allocation9 + $0xc0] sm:$0xff] }
  0x65   :  { %569 = vmatprep.subr.bf16.mxu1 %v568_v17  ;;  %v592_v55 = vpack.c.bf16 %v364_v54, %v363_v53  ;;  %v347_v56 = vld [vmem:[#allocation9 + $0x30] sm:$0xff]  ;;  %v348_v57 = vld [vmem:[#allocation9 + $0x38] sm:$0xff]  ;;  %v366_v60 = vld [vmem:[#allocation9 + $0xc8] sm:$0xff] }
  0x66   :  { %543 = vmatpush1.bf16.msra.mxu0 %v542_v12  ;;  %v594_v58 = vpack.c.bf16 %v348_v57, %v347_v56  ;;  %v596_v61 = vpack.c.bf16 %v366_v60, %v365_v59  ;;  %v349_v62 = vld [vmem:[#allocation9 + $0x40] sm:$0xff]  ;;  %v350_v63 = vld [vmem:[#allocation9 + $0x48] sm:$0xff]  ;;  %v367_v2 = vld [vmem:[#allocation9 + $0xd0] sm:$0xff] }
  0x67   :  { %545 = vmatprep.subr.bf16.mxu0 %v544_v13  ;;  %v598_v1 = vpack.c.bf16 %v350_v63, %v349_v62  ;;  %v368_v3 = vld [vmem:[#allocation9 + $0xd8] sm:$0xff]  ;;  %v351_v4 = vld [vmem:[#allocation9 + $0x50] sm:$0xff]  ;;  %v369_v7 = vld [vmem:[#allocation9 + $0xe0] sm:$0xff] }
  0x68   :  { %571 = vmatpush1.bf16.msra.mxu1 %v570_v23  ;;  %v600_v5 = vpack.c.bf16 %v368_v3, %v367_v2  ;;  %v352_v6 = vld [vmem:[#allocation9 + $0x58] sm:$0xff]  ;;  %v370_v8 = vld [vmem:[#allocation9 + $0xe8] sm:$0xff]  ;;  %v353_v11 = vld [vmem:[#allocation9 + $0x60] sm:$0xff] }
  0x69   :  { %573 = vmatprep.subr.bf16.mxu1 %v572_v24  ;;  %v602_v9 = vpack.c.bf16 %v352_v6, %v351_v4  ;;  %v604_v10 = vpack.c.bf16 %v370_v8, %v369_v7  ;;  %v354_v12 = vld [vmem:[#allocation9 + $0x68] sm:$0xff]  ;;  %v371_v14 = vld [vmem:[#allocation9 + $0xf0] sm:$0xff]  ;;  %v372_v15 = vld [vmem:[#allocation9 + $0xf8] sm:$0xff] }
  0x6a   :  { %547 = vmatpush1.bf16.msra.mxu0 %v546_v22  ;;  %v606_v13 = vpack.c.bf16 %v354_v12, %v353_v11  ;;  %v608_v16 = vpack.c.bf16 %v372_v15, %v371_v14  ;;  %v355_v17 = vld [vmem:[#allocation9 + $0x70] sm:$0xff]  ;;  %v356_v18 = vld [vmem:[#allocation9 + $0x78] sm:$0xff] }
  0x6b   :  { %581 = vmatprep.subr.bf16.mxu0 %v580_v38  ;;  %v610_v19 = vpack.c.bf16 %v356_v18, %v355_v17 }
  0x6c   :  { %575 = vmatpush1.bf16.msra.mxu1 %v574_v30 }
  0x6d   :  { %178 = vmatmul.mubr.f32.vlgmr.msra.gmra.mrb[0].mxu0 %v79_v29  ;;  %577 = vmatprep.subr.bf16.mxu1 %v576_v31 }
  0x6e   :  { %183 = vmatprep.mubr.f32.mxu0 %v772_v0  ;;  %583 = vmatpush3.bf16.msra.mxu0 %v582_v41 }
  0x6f   :  { %585 = vmatprep.subr.bf16.mxu0 %v584_v44 }
  0x70   :  { %579 = vmatpush1.bf16.msra.mxu1 %v578_v35 }
  0x71   :  { %184 = vmatmul.mubr.f32.gmra.mrb[2].mxu0 %v80_v34  ;;  %612 = vmatprep.subr.bf16.mxu1 %v580_v38 }
  0x72   :  { %587 = vmatpush3.bf16.msra.mxu0 %v586_v47 }
  0x73   :  { %287 = vmatmul.mubr.f32.vlgmr.msra.gmra.mrb[0].mxu1 %v79_v29 }
  0x74   :  { %292 = vmatprep.mubr.f32.mxu1 %v772_v0  ;;  %620 = vmatpush3.bf16.msra.mxu1 %v582_v41  ;;  %v361_v0 = vld [vmem:[#allocation9 + $0xa0] sm:$0xff] }
  0x75   :  { %613 = vmatprep.subr.bf16.mxu1 %v584_v44  ;;  %v588_v49 = vpack.c.bf16 %v362_v48, %v361_v0 }
  0x77   :  { %293 = vmatmul.mubr.f32.gmra.mrb[2].mxu1 %v80_v34  ;;  %589 = vmatprep.subr.bf16.mxu0 %v588_v49 }
  0x78   :  { %621 = vmatpush3.bf16.msra.mxu1 %v586_v47  ;;  %591 = vmatpush3.bf16.msra.mxu0 %v590_v52 }
  0x79   :  { %614 = vmatprep.subr.bf16.mxu1 %v588_v49  ;;  %593 = vmatprep.subr.bf16.mxu0 %v592_v55 }
  0x7c   :  { %622 = vmatpush3.bf16.msra.mxu1 %v590_v52  ;;  %595 = vmatpush3.bf16.msra.mxu0 %v594_v58 }
  0x7d   :  { %615 = vmatprep.subr.bf16.mxu1 %v592_v55  ;;  %597 = vmatprep.subr.bf16.mxu0 %v596_v61 }
  0x80   :  { %623 = vmatpush3.bf16.msra.mxu1 %v594_v58  ;;  %599 = vmatpush3.bf16.msra.mxu0 %v598_v1 }
  0x81   :  { %616 = vmatprep.subr.bf16.mxu1 %v596_v61  ;;  %601 = vmatprep.subr.bf16.mxu0 %v600_v5 }
  0x84   :  { %624 = vmatpush3.bf16.msra.mxu1 %v598_v1  ;;  %603 = vmatpush3.bf16.msra.mxu0 %v602_v9 }
  0x85   :  { %617 = vmatprep.subr.bf16.mxu1 %v600_v5  ;;  %605 = vmatprep.subr.bf16.mxu0 %v604_v10 }
  0x88   :  { %625 = vmatpush3.bf16.msra.mxu1 %v602_v9  ;;  %607 = vmatpush3.bf16.msra.mxu0 %v606_v13 }
  0x89   :  { %618 = vmatprep.subr.bf16.mxu1 %v604_v10  ;;  %609 = vmatprep.subr.bf16.mxu0 %v608_v16 }
  0x8c   :  { %626 = vmatpush3.bf16.msra.mxu1 %v606_v13  ;;  %611 = vmatpush3.bf16.msra.mxu0 %v610_v19 }
  0x8d   :  { %619 = vmatprep.subr.bf16.mxu1 %v608_v16 }
  0x90   :  { %627 = vmatpush3.bf16.msra.mxu1 %v610_v19 }
 0x140   :  { %v179_v20 = vpop.f32.mrb[0].mxu0 }
 0x141   :  { %v299_v21 = vmul.f32 %v179_v20, %v179_v20  ;;  %v181_v22 = vpop.f32.mrb[1].mxu0 }
 0x142   :  { %v300_v23 = vmul.f32 %v181_v22, %v181_v22 }
 0x143   :  { %v303_v24 = vmul.f32 %v299_v21, %v179_v20 }
 0x144   :  { %v304_v25 = vmul.f32 %v300_v23, %v181_v22  ;;  %v185_v26 = vpop.f32.mrb[2].mxu0 }
 0x145   :  { %v307_v27 = vmul.f32 0.044715, %v303_v24  ;;  %v301_v28 = vmul.f32 %v185_v26, %v185_v26  ;;  %v187_v29 = vpop.f32.mrb[3].mxu0 }
 0x146   :  { %v308_v30 = vmul.f32 0.044715, %v304_v25  ;;  %v302_v31 = vmul.f32 %v187_v29, %v187_v29  ;;  %v288_v38 = vpop.f32.mrb[0].mxu1 }
 0x147   :  { %v311_v32 = vadd.f32 %v307_v27, %v179_v20  ;;  %v305_v33 = vmul.f32 %v301_v28, %v185_v26  ;;  %v290_v41 = vpop.f32.mrb[1].mxu1 }
 0x148   :  { %v312_v34 = vadd.f32 %v308_v30, %v181_v22  ;;  %v306_v35 = vmul.f32 %v302_v31, %v187_v29 }
 0x149   :  { %v315_v36 = vmul.f32 0.7978846, %v311_v32  ;;  %v309_v37 = vmul.f32 0.044715, %v305_v33 }
 0x14a   :  { %v316_v39 = vmul.f32 0.7978846, %v312_v34  ;;  %v310_v40 = vmul.f32 0.044715, %v306_v35  ;;  %v294_v45 = vpop.f32.mrb[2].mxu1 }
 0x14b   :  { %638 = vtanh.f32 %v315_v36  ;;  %v313_v42 = vadd.f32 %v309_v37, %v185_v26  ;;  %v296_v47 = vpop.f32.mrb[3].mxu1 }
 0x14c   :  { %640 = vtanh.f32 %v316_v39  ;;  %v314_v43 = vadd.f32 %v310_v40, %v187_v29 }
 0x14d   :  { %v317_v44 = vmul.f32 0.7978846, %v313_v42 }
 0x14e   :  { %v318_v46 = vmul.f32 0.7978846, %v314_v43 }
 0x14f   :  { %642 = vtanh.f32 %v317_v44 }
 0x150   :  { %644 = vtanh.f32 %v318_v46 }
 0x155   :  { %v639_v0 = vpop.eup %638 }
 0x156   :  { %v641_v48 = vpop.eup %640  ;;  %v323_v49 = vadd.f32 1.0, %v639_v0 }
 0x157   :  { %v324_v50 = vadd.f32 1.0, %v641_v48 }
 0x158   :  { %v327_v51 = vmul.f32 0.5, %v323_v49 }
 0x159   :  { %v643_v52 = vpop.eup %642  ;;  %v328_v53 = vmul.f32 0.5, %v324_v50 }
 0x15a   :  { %v645_v54 = vpop.eup %644  ;;  %v331_v55 = vmul.f32 %v327_v51, %v179_v20  ;;  %v325_v56 = vadd.f32 1.0, %v643_v52 }
 0x15b   :  { %v332_v57 = vmul.f32 %v328_v53, %v181_v22  ;;  %v326_v58 = vadd.f32 1.0, %v645_v54 }
 0x15c   :  { %v335_v59 = vmul.f32 %v331_v55, %v288_v38  ;;  %v329_v60 = vmul.f32 0.5, %v325_v56 }
 0x15d   :  { %v336_v61 = vmul.f32 %v332_v57, %v290_v41  ;;  %v330_v62 = vmul.f32 0.5, %v326_v58 }
 0x15e   :  { %v333_v63 = vmul.f32 %v329_v60, %v185_v26 }
 0x15f   :  { %v334_v1 = vmul.f32 %v330_v62, %v187_v29  ;;  %437 = vmatprep.mubr.f32.mxu0 %v336_v61 }
 0x160   :  { %v337_v2 = vmul.f32 %v333_v63, %v294_v45  ;;  %438 = vmatmul.mubr.f32.vlgmr.msra.gmra.mrb[4].mxu0 %v335_v59 }
 0x161   :  { %v338_v3 = vmul.f32 %v334_v1, %v296_v47 }
 0x163   :  { %442 = vmatprep.mubr.f32.mxu1 %v338_v3 }
 0x164   :  { %443 = vmatmul.mubr.f32.vlgmr.msra.gmra.mrb[4].mxu1 %v337_v2 }
 0x233   :  { %v510_v4 = vpop.f32.mrb[4].mxu0 }
 0x234   :  { %v511_v5 = vpop.f32.mrb[5].mxu0 }
 0x235   :  { %v512_v6 = vadd.f32 %v511_v5, %v510_v4 }
 0x237   :  { %457 = vst [vmem:[#allocation11] sm:$0xff] %v512_v6  ;;  %v513_v7 = vpop.f32.mrb[4].mxu1 }
 0x238   :  { %v514_v8 = vpop.f32.mrb[5].mxu1 }
 0x239   :  { %v515_v9 = vadd.f32 %v514_v8, %v513_v7 }
 0x23b   :  { %458 = vst [vmem:[#allocation11 + $0x8] sm:$0xff] %v515_v9 }
 0x23c   :  { %745 = shalt.err (!%p742_p8)
}
 0x23d   :  { %s746_s17 = scalar_lea.hbm %s889_s4, 256 }
 0x23e   :  { %p747_p9 = scmp.ne.s32.totalorder %s889_s4, %s746_s17  ;;  %p750_p10 = scmp.lt.u32.totalorder %s746_s17, %s889_s4 }
 0x240   :  { %p752_p11 = pnand %p750_p10, %p747_p9 }
 0x242   :  { %755 = shalt.err (!%p752_p11)
}
 0x243   :  { %470 = dma.vmem_to_hbm [thread:$0]  %s465_s26, 256, %s889_s4, [#allocation5], %s768_s1, %s768_s1, %s769_s13  }
 0x244   :  { %762 = dma.done.wait [#allocation5], 256  }
 0x245   :  { %763 = vsyncadd [#allocation5], 4294967040 }
 0x246   :  { %474 = vsyncpa [#allocation4], 1 }
 0x247   :  { %475 = vsyncpa [#allocation7], 1 }
 0x248   :  { %476 = vsyncpa [#allocation10], 1 }
 0x249   :  { %477 = vsyncpa [#allocation5], 1 }

</bundles_post_ra>
